<compile_context>
chip_gen: v5e
topology: v5e:2x2
jax: 0.10.0
libtpu: 0.0.40
codegen_flags: <defaults>
</compile_context>

<pallas_src>
import jax
import jax.numpy as jnp
from jax.experimental import pallas as pl
from jax.experimental.pallas import tpu as pltpu

# Module hyper-parameters (consistent with the reference __init__ defaults)
HIDDEN_SIZE = 32
ACTION_DISCRETISATION = 5
NUM_ACTIONS = ACTION_DISCRETISATION
STATE_DIM = 3
ACTION_DIM = 1
OUT_DIM = NUM_ACTIONS * ACTION_DIM   # true output width (5)
OUT_PAD = 8                          # padded output width (5 -> 8); 32 B/row of f32
BATCH = 8


def _round_up(x, m):
    return ((x + m - 1) // m) * m


def _cdiv(a, b):
    return (a + b - 1) // b


def _mlp_kernel(s_ref, t_ref, w1_ref, b1_ref, w2_ref, b2_ref, w3_ref, b3_ref, out_ref):
    """tanh(layer1) -> tanh(.@W2 + b2) -> .@W3p + b3p, all f32; (blk, 8) output tile."""
    s = s_ref[...]            # (blk, STATE_DIM) f32
    t = t_ref[...]            # (blk, 1)         f32
    w1 = w1_ref[...]          # (STATE_DIM+1, H) f32

    # Layer 1: (state_dim+1)=4 VPU broadcast mul-adds.  A K=3 MXU dot underfills the
    # systolic array and still pays full fill/drain latency, so keep it off the MXU.
    h1 = t * w1[STATE_DIM:STATE_DIM + 1, :] + b1_ref[...]
    for d in range(STATE_DIM):
        h1 = h1 + s[:, d:d + 1] * w1[d:d + 1, :]
    h1 = jnp.tanh(h1)                                                   # (blk, H) f32

    # Layer 2: f32 MXU, f32 accumulate.
    h2 = jnp.tanh(jnp.dot(h1, w2_ref[...],
                          preferred_element_type=jnp.float32) + b2_ref[...])   # (blk, H)

    # Layer 3: f32 MXU into the narrow (blk, 8) output tile.
    out_ref[...] = jnp.dot(h2, w3_ref[...],
                           preferred_element_type=jnp.float32) + b3_ref[...]


def pack_params(params):
    """One-time weight preprocessing: zero-pad W3/b3 from 5 to 8 output columns (f32)."""
    w1, b1, w2, b2, w3, b3 = params
    f32 = jnp.float32
    w3p = jnp.zeros((w3.shape[0], OUT_PAD), f32).at[:, :OUT_DIM].set(w3.astype(f32))
    b3p = jnp.zeros((1, OUT_PAD), f32).at[:, :OUT_DIM].set(b3.reshape(1, -1).astype(f32))
    return (w1.astype(f32), b1.reshape(1, -1).astype(f32),
            w2.astype(f32), b2.reshape(1, -1).astype(f32), w3p, b3p)


def _choose_block(B, batch_block):
    """8-aligned batch block; >=2 blocks for moderate B so v7x's second TC gets work."""
    B8 = _round_up(B, 8)
    if B8 <= 256:                # tiny act()-style batches: one block, minimal overhead
        return B8
    return min(batch_block, _round_up(_cdiv(B8, 2), 8))


def time_dqn_forward(state, time, packed, *, batch_block=2048):
    """state: (B, state_dim), time: (B, 1) -> (B, action_dim, ACTION_DISCRETISATION)."""
    w1, b1, w2, b2, w3p, b3p = packed
    B = state.shape[0]
    H = w2.shape[0]

    state = state.astype(jnp.float32)
    time = time.astype(jnp.float32)

    blk = _choose_block(B, batch_block)
    grid = (_cdiv(B, blk),)          # ragged last block: OOB writes are masked, no padding

    flops = 2 * B * ((STATE_DIM + 1) * H + H * H + H * OUT_PAD)
    transcendentals = 2 * B * H
    bytes_accessed = (4 * (state.size + time.size + B * OUT_PAD)
                      + 4 * (w1.size + b1.size + w2.size + b2.size + w3p.size + b3p.size))

    const = lambda shape: pl.BlockSpec(shape, lambda i: (0, 0))   # weights stay resident

    out = pl.pallas_call(
        _mlp_kernel,
        out_shape=jax.ShapeDtypeStruct((B, OUT_PAD), jnp.float32),
        grid=grid,
        in_specs=[
            pl.BlockSpec((blk, STATE_DIM), lambda i: (i, 0)),
            pl.BlockSpec((blk, 1), lambda i: (i, 0)),
            const(w1.shape), const(b1.shape),
            const(w2.shape), const(b2.shape),
            const(w3p.shape), const(b3p.shape),
        ],
        out_specs=pl.BlockSpec((blk, OUT_PAD), lambda i: (i, 0)),
        compiler_params=pltpu.CompilerParams(dimension_semantics=("parallel",)),
        cost_estimate=pl.CostEstimate(flops=flops, transcendentals=transcendentals,
                                      bytes_accessed=bytes_accessed),
    )(state, time, w1, b1, w2, b2, w3p, b3p)

    # Drop the 3 padded output lanes, then .view(-1, action_dim, ACTION_DISCRETISATION)
    return out[:, :OUT_DIM].reshape(-1, ACTION_DIM, ACTION_DISCRETISATION)


def init_params(key):
    """Deterministic init mimicking torch.nn.Linear (uniform +/- 1/sqrt(fan_in))."""
    dims = [(STATE_DIM + 1, HIDDEN_SIZE),
            (HIDDEN_SIZE, HIDDEN_SIZE),
            (HIDDEN_SIZE, OUT_DIM)]
    params = []
    for fan_in, fan_out in dims:
        key, kw, kb = jax.random.split(key, 3)
        bound = 1.0 / jnp.sqrt(jnp.float32(fan_in))
        w = jax.random.uniform(kw, (fan_in, fan_out), jnp.float32, -bound, bound)
        b = jax.random.uniform(kb, (1, fan_out), jnp.float32, -bound, bound)
        params.extend([w, b])
    return tuple(params)


def _reference_forward(state, time, params):
    """Pure-f32 JAX reference (matches the PyTorch module exactly)."""
    w1, b1, w2, b2, w3, b3 = params
    x = jnp.concatenate([state, time], axis=-1)
    h1 = jnp.tanh(x @ w1 + b1)
    h2 = jnp.tanh(h1 @ w2 + b2)
    out = h2 @ w3 + b3
    return out.reshape(-1, ACTION_DIM, ACTION_DISCRETISATION)


if __name__ == "__main__":
    key = jax.random.PRNGKey(0)
    k_state, k_time, k_params = jax.random.split(key, 3)

    state = jax.random.normal(k_state, (BATCH, STATE_DIM), jnp.float32)
    time = jax.random.uniform(k_time, (BATCH, 1), jnp.float32)
    params = init_params(k_params)
    packed = pack_params(params)

    fwd = jax.jit(time_dqn_forward)
    values = jax.block_until_ready(fwd(state, time, packed))
    assert values.shape == (BATCH, ACTION_DIM, ACTION_DISCRETISATION)

    # Check vs. the f32 module semantics.  Tolerance covers the MXU's default f32
    # matmul precision (multi-pass bf16) inside / outside the kernel.
    ref = _reference_forward(state, time, params)
    assert jnp.allclose(values, ref, atol=1e-2, rtol=1e-2)

    # Exercise the multi-block ragged path (B=300, blk=152 -> 2 "parallel" blocks,
    # masked last block instead of padding to 512 rows).
    k_s2, k_t2 = jax.random.split(jax.random.PRNGKey(1))
    B2 = 300
    state2 = jax.random.normal(k_s2, (B2, STATE_DIM), jnp.float32)
    time2 = jax.random.uniform(k_t2, (B2, 1), jnp.float32)
    values2 = jax.block_until_ready(fwd(state2, time2, packed))
    ref2 = _reference_forward(state2, time2, params)
    assert values2.shape == (B2, ACTION_DIM, ACTION_DISCRETISATION)
    assert jnp.allclose(values2, ref2, atol=1e-2, rtol=1e-2)

    print("KERNEL_OK")
</pallas_src>

<mosaic_0001>
module attributes {stable_mosaic.version = 11 : i64} {
  func.func @_mlp_kernel(%arg0: i32, %arg1: memref<8x3xf32, #tpu.memory_space<vmem>>, %arg2: memref<8x1xf32, #tpu.memory_space<vmem>>, %arg3: memref<4x32xf32, #tpu.memory_space<vmem>>, %arg4: memref<1x32xf32, #tpu.memory_space<vmem>>, %arg5: memref<32x32xf32, #tpu.memory_space<vmem>>, %arg6: memref<1x32xf32, #tpu.memory_space<vmem>>, %arg7: memref<32x8xf32, #tpu.memory_space<vmem>>, %arg8: memref<1x8xf32, #tpu.memory_space<vmem>>, %arg9: memref<8x8xf32, #tpu.memory_space<vmem>>) attributes {dimension_semantics = [#tpu.dimension_semantics<parallel>], iteration_bounds = array<i64: 1>, scalar_prefetch = 0 : i64, scratch_operands = 0 : i64, tpu.core_type = #tpu.core_type<tc>, window_params = [{transform_indices = @transform_0, window_bounds = array<i64: 8, 3>}, {transform_indices = @transform_1, window_bounds = array<i64: 8, 1>}, {pipeline_mode = #tpu.pipeline_mode<synchronous>, transform_indices = @transform_2, window_bounds = array<i64: 4, 32>}, {pipeline_mode = #tpu.pipeline_mode<synchronous>, transform_indices = @transform_3, window_bounds = array<i64: 1, 32>}, {pipeline_mode = #tpu.pipeline_mode<synchronous>, transform_indices = @transform_4, window_bounds = array<i64: 32, 32>}, {pipeline_mode = #tpu.pipeline_mode<synchronous>, transform_indices = @transform_5, window_bounds = array<i64: 1, 32>}, {pipeline_mode = #tpu.pipeline_mode<synchronous>, transform_indices = @transform_6, window_bounds = array<i64: 32, 8>}, {pipeline_mode = #tpu.pipeline_mode<synchronous>, transform_indices = @transform_7, window_bounds = array<i64: 1, 8>}, {transform_indices = @transform_8, window_bounds = array<i64: 8, 8>}]} {
    %c0 = arith.constant 0 : index
    %c0_0 = arith.constant 0 : index
    %0 = vector.load %arg1[%c0, %c0_0] : memref<8x3xf32, #tpu.memory_space<vmem>>, vector<8x3xf32>
    %c0_1 = arith.constant 0 : index
    %c0_2 = arith.constant 0 : index
    %1 = vector.load %arg2[%c0_1, %c0_2] : memref<8x1xf32, #tpu.memory_space<vmem>>, vector<8x1xf32>
    %c0_3 = arith.constant 0 : index
    %c0_4 = arith.constant 0 : index
    %2 = vector.load %arg3[%c0_3, %c0_4] : memref<4x32xf32, #tpu.memory_space<vmem>>, vector<4x32xf32>
    %3 = vector.extract_strided_slice %2 {offsets = [3, 0], sizes = [1, 32], strides = [1, 1]} : vector<4x32xf32> to vector<1x32xf32>
    %4 = vector.broadcast %1 : vector<8x1xf32> to vector<8x32xf32>
    %5 = vector.broadcast %3 : vector<1x32xf32> to vector<8x32xf32>
    %6 = arith.mulf %4, %5 : vector<8x32xf32>
    %c0_5 = arith.constant 0 : index
    %c0_6 = arith.constant 0 : index
    %7 = vector.load %arg4[%c0_5, %c0_6] : memref<1x32xf32, #tpu.memory_space<vmem>>, vector<1x32xf32>
    %8 = vector.broadcast %7 : vector<1x32xf32> to vector<8x32xf32>
    %9 = arith.addf %6, %8 : vector<8x32xf32>
    %10 = vector.extract_strided_slice %0 {offsets = [0, 0], sizes = [8, 1], strides = [1, 1]} : vector<8x3xf32> to vector<8x1xf32>
    %11 = vector.extract_strided_slice %2 {offsets = [0, 0], sizes = [1, 32], strides = [1, 1]} : vector<4x32xf32> to vector<1x32xf32>
    %12 = vector.broadcast %10 : vector<8x1xf32> to vector<8x32xf32>
    %13 = vector.broadcast %11 : vector<1x32xf32> to vector<8x32xf32>
    %14 = arith.mulf %12, %13 : vector<8x32xf32>
    %15 = arith.addf %9, %14 : vector<8x32xf32>
    %16 = vector.extract_strided_slice %0 {offsets = [0, 1], sizes = [8, 1], strides = [1, 1]} : vector<8x3xf32> to vector<8x1xf32>
    %17 = vector.extract_strided_slice %2 {offsets = [1, 0], sizes = [1, 32], strides = [1, 1]} : vector<4x32xf32> to vector<1x32xf32>
    %18 = vector.broadcast %16 : vector<8x1xf32> to vector<8x32xf32>
    %19 = vector.broadcast %17 : vector<1x32xf32> to vector<8x32xf32>
    %20 = arith.mulf %18, %19 : vector<8x32xf32>
    %21 = arith.addf %15, %20 : vector<8x32xf32>
    %22 = vector.extract_strided_slice %0 {offsets = [0, 2], sizes = [8, 1], strides = [1, 1]} : vector<8x3xf32> to vector<8x1xf32>
    %23 = vector.extract_strided_slice %2 {offsets = [2, 0], sizes = [1, 32], strides = [1, 1]} : vector<4x32xf32> to vector<1x32xf32>
    %24 = vector.broadcast %22 : vector<8x1xf32> to vector<8x32xf32>
    %25 = vector.broadcast %23 : vector<1x32xf32> to vector<8x32xf32>
    %26 = arith.mulf %24, %25 : vector<8x32xf32>
    %27 = arith.addf %21, %26 : vector<8x32xf32>
    %28 = math.tanh %27 : vector<8x32xf32>
    %c0_7 = arith.constant 0 : index
    %c0_8 = arith.constant 0 : index
    %29 = vector.load %arg5[%c0_7, %c0_8] : memref<32x32xf32, #tpu.memory_space<vmem>>, vector<32x32xf32>
    %cst = arith.constant dense<0.000000e+00> : vector<8x32xf32>
    %30 = tpu.matmul %28, %29, %cst {dimension_numbers = #tpu.dot_dimension_numbers<[1], [0], [0], [1], [0, 0, 1, 1], [], []>} : vector<8x32xf32>, vector<32x32xf32>, vector<8x32xf32> -> vector<8x32xf32>
    %c0_9 = arith.constant 0 : index
    %c0_10 = arith.constant 0 : index
    %31 = vector.load %arg6[%c0_9, %c0_10] : memref<1x32xf32, #tpu.memory_space<vmem>>, vector<1x32xf32>
    %32 = vector.broadcast %31 : vector<1x32xf32> to vector<8x32xf32>
    %33 = arith.addf %30, %32 : vector<8x32xf32>
    %34 = math.tanh %33 : vector<8x32xf32>
    %c0_11 = arith.constant 0 : index
    %c0_12 = arith.constant 0 : index
    %35 = vector.load %arg7[%c0_11, %c0_12] : memref<32x8xf32, #tpu.memory_space<vmem>>, vector<32x8xf32>
    %cst_13 = arith.constant dense<0.000000e+00> : vector<8x8xf32>
    %36 = tpu.matmul %34, %35, %cst_13 {dimension_numbers = #tpu.dot_dimension_numbers<[1], [0], [0], [1], [0, 0, 1, 1], [], []>} : vector<8x32xf32>, vector<32x8xf32>, vector<8x8xf32> -> vector<8x8xf32>
    %c0_14 = arith.constant 0 : index
    %c0_15 = arith.constant 0 : index
    %37 = vector.load %arg8[%c0_14, %c0_15] : memref<1x8xf32, #tpu.memory_space<vmem>>, vector<1x8xf32>
    %38 = vector.broadcast %37 : vector<1x8xf32> to vector<8x8xf32>
    %39 = arith.addf %36, %38 : vector<8x8xf32>
    %c0_16 = arith.constant 0 : index
    %c0_17 = arith.constant 0 : index
    %40 = vector.load %arg9[%c0_16, %c0_17] : memref<8x8xf32, #tpu.memory_space<vmem>>, vector<8x8xf32>
    tpu.vector_store %arg9[%c0_16, %c0_17], %39 {strides = array<i32>} : memref<8x8xf32, #tpu.memory_space<vmem>>, vector<8x8xf32>,
    return
  }
  func.func @transform_0(%arg0: i32) -> (i32, i32) {
    %c0_i32 = arith.constant 0 : i32
    %c0_i32_0 = arith.constant 0 : i32
    return %arg0, %c0_i32 : i32, i32
  }
  func.func @transform_1(%arg0: i32) -> (i32, i32) {
    %c0_i32 = arith.constant 0 : i32
    %c0_i32_0 = arith.constant 0 : i32
    return %arg0, %c0_i32 : i32, i32
  }
  func.func @transform_2(%arg0: i32) -> (i32, i32) {
    %c0_i32 = arith.constant 0 : i32
    %c0_i32_0 = arith.constant 0 : i32
    %c0_i32_1 = arith.constant 0 : i32
    return %c0_i32, %c0_i32_0 : i32, i32
  }
  func.func @transform_3(%arg0: i32) -> (i32, i32) {
    %c0_i32 = arith.constant 0 : i32
    %c0_i32_0 = arith.constant 0 : i32
    %c0_i32_1 = arith.constant 0 : i32
    return %c0_i32, %c0_i32_0 : i32, i32
  }
  func.func @transform_4(%arg0: i32) -> (i32, i32) {
    %c0_i32 = arith.constant 0 : i32
    %c0_i32_0 = arith.constant 0 : i32
    %c0_i32_1 = arith.constant 0 : i32
    return %c0_i32, %c0_i32_0 : i32, i32
  }
  func.func @transform_5(%arg0: i32) -> (i32, i32) {
    %c0_i32 = arith.constant 0 : i32
    %c0_i32_0 = arith.constant 0 : i32
    %c0_i32_1 = arith.constant 0 : i32
    return %c0_i32, %c0_i32_0 : i32, i32
  }
  func.func @transform_6(%arg0: i32) -> (i32, i32) {
    %c0_i32 = arith.constant 0 : i32
    %c0_i32_0 = arith.constant 0 : i32
    %c0_i32_1 = arith.constant 0 : i32
    return %c0_i32, %c0_i32_0 : i32, i32
  }
  func.func @transform_7(%arg0: i32) -> (i32, i32) {
    %c0_i32 = arith.constant 0 : i32
    %c0_i32_0 = arith.constant 0 : i32
    %c0_i32_1 = arith.constant 0 : i32
    return %c0_i32, %c0_i32_0 : i32, i32
  }
  func.func @transform_8(%arg0: i32) -> (i32, i32) {
    %c0_i32 = arith.constant 0 : i32
    %c0_i32_0 = arith.constant 0 : i32
    return %arg0, %c0_i32 : i32, i32
  }
}

</mosaic_0001>

<bundles_post_ra>
// kernel: time_dqn_forward.1
= control target key start
LH: loop header
LB: loop body
LE: loop exit
PB: predicated region body
PF: predicated region fallthrough
CT: control target
= control target key end

     0   :  { %v153_v0 = vmov 0   ;;  %v154_v2 = vmov 1   ;;  %v155_v4 = vmov 2   ;;  %vm75_vm0 = vcmask 261120   ;;  %s248_s1 = inlined_call_operand.vmem [shape: f32[8,1], index: 1, kind: input, shape index: {}]   ;;  %s249_s0 = inlined_call_operand.vmem [shape: f32[8,3], index: 0, kind: input, shape index: {}]   ;;  %s250_s3 = inlined_call_operand.vmem [shape: f32[1,32], index: 3, kind: input, shape index: {}]   ;;  %s251_s5 = inlined_call_operand.vmem [shape: f32[1,32], index: 5, kind: input, shape index: {}]   ;;  %s252_s4 = inlined_call_operand.vmem [shape: f32[32,32], index: 4, kind: input, shape index: {}]   ;;  %s253_s2 = inlined_call_operand.vmem [shape: f32[4,32], index: 2, kind: input, shape index: {}]   ;;  %s254_s7 = inlined_call_operand.vmem [shape: f32[1,8], index: 7, kind: input, shape index: {}]   ;;  %s255_s6 = inlined_call_operand.vmem [shape: f32[32,8], index: 6, kind: input, shape index: {}]   ;;  %s256_s8 = inlined_call_operand.vmem [shape: f32[8,8], index: 8, kind: output, shape index: {}]  }
   0x1   :  { %142 = vset.pattern.permute.xlu0 %v153_v0  ;;  %v30_v1 = vld [vmem:[%s248_s1] sm:$0xff]  ;;  %143 = vset.pattern.permute.xlu1 %v154_v2  ;;  %v70_v5 = vld [vmem:[%s252_s4 + $0x18] sm:$0xff]  ;;  %v69_v6 = vld [vmem:[%s252_s4 + $0x10] sm:$0xff]  ;;  %vm131_vm1 = vcmask 64512  }
   0x2   :  { %v29_v3 = vld [vmem:[%s249_s0] sm:$0xff]  ;;  %34 = vperm.xlu0 %142, %v30_v1   ;;  %91 = vmatpush.msra.mxu0 %v70_v5  ;;  %v68_v7 = vld [vmem:[%s252_s4 + $0x8] sm:$0xff]  ;;  %v103_v28 = vld [vmem:[%s255_s6 + $0x18] sm:$0xff] }
   0x3   :  { %53 = vperm.xlu1 %143, %v29_v3   ;;  %v67_v8 = vld [vmem:[%s252_s4] sm:$0xff]  ;;  %123 = vmatpush.msra.mxu1 %v103_v28  ;;  %v102_v29 = vld [vmem:[%s255_s6 + $0x10] sm:$0xff]  ;;  %v101_v30 = vld [vmem:[%s255_s6 + $0x8] sm:$0xff] }
   0x4   :  { %92 = vmatpush.msra.mxu0 %v69_v6  ;;  %v31_v9 = vld [vmem:[%s253_s2] sm:$0xf] }
   0x5   :  { %v37_v12 = vperm.slane %v31_v9, 3  ;;  %v146_v13 = vld [vmem:[%s250_s3] ss:$0 sm:$0xff]  ;;  %v49_v15 = vperm.slane %v31_v9, 0  ;;  %v56_v16 = vperm.slane %v31_v9, 1  ;;  %v63_v17 = vperm.slane %v31_v9, 2  ;;  %124 = vmatpush.msra.mxu1 %v102_v29 }
   0x6   :  { %93 = vmatpush.msra.mxu0 %v68_v7  ;;  %v100_v31 = vld [vmem:[%s255_s6] sm:$0xff] }
   0x7   :  { %125 = vmatpush.msra.mxu1 %v101_v30  ;;  %v147_v32 = vld [vmem:[%s251_s5] ss:$0 sm:$0xff] }
   0x8   :  { %94 = vmatpush.msra.mxu0 %v67_v8  ;;  %v148_v36 = vld [vmem:[%s254_s7] ss:$0 sm:$0xff] }
   0x9   :  { %126 = vmatpush.msra.mxu1 %v100_v31 }
   0xa   :  { %46 = vperm.xlu0 %142, %v29_v3  }
   0xb   :  { %144 = vset.pattern.permute.xlu1 %v155_v4 }
   0xc   :  { %60 = vperm.xlu1 %144, %v29_v3  }
  0x12   :  { %145 = vset.pattern.permute.xlu0 %v155_v4 }
  0x74   :  { %v35_v10 = vpop.permute.xlu0 %34 }
  0x75   :  { %v54_v11 = vpop.permute.xlu1 %53  ;;  %v38_v14 = vmul.f32 %v37_v12, %v35_v10 }
  0x76   :  { %v57_v22 = vmul.f32 %v56_v16, %v54_v11 }
  0x77   :  { %v43_v19 = vadd.f32 %v146_v13, %v38_v14 }
  0x7c   :  { %v47_v18 = vpop.permute.xlu0 %46 }
  0x7d   :  { %v50_v20 = vmul.f32 %v49_v15, %v47_v18 }
  0x7e   :  { %v61_v21 = vpop.permute.xlu1 %60 }
  0x7f   :  { %v51_v23 = vadd.f32 %v50_v20, %v43_v19  ;;  %v64_v24 = vmul.f32 %v63_v17, %v61_v21 }
  0x81   :  { %v58_v25 = vadd.f32 %v57_v22, %v51_v23 }
  0x83   :  { %v65_v26 = vadd.f32 %v64_v24, %v58_v25 }
  0x85   :  { %149 = vtanh.f32 %v65_v26 }
  0x8b   :  { %v150_v27 = vpop.eup %149 }
  0x8c   :  { %137 = vmatmul.msk.f32.vlgmr.msra.gmra.mxu0 %vm75_vm0, %v150_v27 }
 0x109   :  { %v96_v33 = vpop.f32.mrf.mxu0 }
 0x10a   :  { %v97_v34 = vadd.f32 %v147_v32, %v96_v33 }
 0x10c   :  { %151 = vtanh.f32 %v97_v34 }
 0x112   :  { %v152_v35 = vpop.eup %151 }
 0x113   :  { %138 = vmatmul.msk.f32.vlgmr.msra.gmra.mxu1 %vm75_vm0, %v152_v35 }
 0x190   :  { %v128_v37 = vpop.f32.mrf.mxu1 }
 0x191   :  { %v129_v38 = vadd.f32 %v148_v36, %v128_v37 }
 0x193   :  { %132 = vst.msk [vmem:[%s256_s8] sm:$0xff] %vm131_vm1, %v129_v38 }

</bundles_post_ra>
